<compile_context>
chip_gen: v7x
topology: tpu7x:2x2x1
jax: 0.10.0
libtpu: 0.0.40
codegen_flags: <defaults>
</compile_context>

<pallas_src>
import math

import jax
import jax.numpy as jnp
from jax.experimental import pallas as pl
from jax.experimental.pallas import tpu as pltpu


def _add_pe_kernel(x_ref, pe_ref, o_ref):
    # x_ref / o_ref blocks: (tr, D) in x.dtype; pe_ref block: (tr, D) float32 (batch-invariant).
    # Add in f32 (matches the PyTorch fp32 `pe` buffer), downcast on store.
    o_ref[...] = (x_ref[...] + pe_ref[...]).astype(o_ref.dtype)


def sinusoidal_pe(seq_len, d_model):
    """Builds the PE buffer exactly like the PyTorch __init__ (once, outside the kernel)."""
    position = jnp.arange(seq_len, dtype=jnp.float32)[:, None]                 # (S, 1)
    div_term = jnp.exp(
        jnp.arange(0, d_model, 2, dtype=jnp.float32) * (-math.log(10000.0) / d_model)
    )                                                                          # (D/2,)
    angles = position * div_term                                               # (S, D/2)
    pe = jnp.zeros((seq_len, d_model), jnp.float32)
    pe = pe.at[:, 0::2].set(jnp.sin(angles))
    pe = pe.at[:, 1::2].set(jnp.cos(angles))
    return pe                                                                  # float32 (S, D)


def _target_block_bytes():
    """Per-generation target for the x block size (bytes)."""
    try:
        kind = jax.devices()[0].device_kind.lower()
    except Exception:
        return 2 << 20
    if "v5" in kind:
        # v5e scoped-VMEM default is only 16 MiB: 3 streams x 2 buffers x 2 MiB = 12 MiB.
        return 2 << 20
    # v6e / v7x: 3 streams x 2 buffers x 4 MiB = 24 MiB fits the 32 MiB scoped default.
    return 4 << 20


def _row_tile(S, D, itemsize):
    """Rows per block so the x block is ~target bytes; multiple of 8 sublanes (or full extent)."""
    tr = _target_block_bytes() // max(1, D * itemsize)
    tr = max(8, tr)
    if tr >= S:
        return S                           # block dim == full array dim is always legal
    return max(8, (tr // 8) * 8)           # ragged last block handled by cdiv grid + masking


def positional_encoding(x, pe=None, *, donate_x=False):
    """x: (B, S, D) -> x + PE[:S]   (same shape & dtype).

    pe: optional precomputed float32 buffer of shape (max_seq_len >= S, D) (module state);
        built on the fly if None.
    donate_x: set True only when x is actually donatable at the jit boundary
        (donate_argnums and not used afterwards); otherwise XLA inserts a defensive copy
        and the in-place aliasing buys nothing.
    """
    B, S, D = x.shape
    if pe is None:
        pe = sinusoidal_pe(S, D)
    else:
        pe = pe[:S].astype(jnp.float32)

    tr = _row_tile(S, D, x.dtype.itemsize)
    grid = (pl.cdiv(S, tr), B)             # seq tiles outer (megacore), batch inner (PE resident)

    alias_kwargs = {"input_output_aliases": {0: 0}} if donate_x else {}

    out = pl.pallas_call(
        _add_pe_kernel,
        out_shape=jax.ShapeDtypeStruct((B, S, D), x.dtype),
        grid_spec=pltpu.PrefetchScalarGridSpec(
            num_scalar_prefetch=0,
            grid=grid,
            in_specs=[
                # Leading batch dim squeezed (None) -> kernel sees clean 2-D (tr, D) refs.
                pl.BlockSpec((None, tr, D), lambda s, b: (b, s, 0)),   # x tile
                pl.BlockSpec((tr, D), lambda s, b: (s, 0)),            # PE tile (batch-invariant)
            ],
            out_specs=pl.BlockSpec((None, tr, D), lambda s, b: (b, s, 0)),
        ),
        compiler_params=pltpu.CompilerParams(
            # Batch axis "arbitrary": guarantees it is iterated sequentially per core so the
            # resident PE block is not re-fetched; megacore shards only the seq axis (v7x).
            dimension_semantics=("parallel", "arbitrary"),
        ),
        **alias_kwargs,
    )(x, pe)

    return out


def _reference(x):
    """Pure-JAX reference matching the PyTorch module exactly."""
    B, S, D = x.shape
    position = jnp.arange(S, dtype=jnp.float32)[:, None]
    div_term = jnp.exp(
        jnp.arange(0, D, 2, dtype=jnp.float32) * (-math.log(10000.0) / D)
    )
    pe = jnp.zeros((S, D), jnp.float32)
    pe = pe.at[:, 0::2].set(jnp.sin(position * div_term))
    pe = pe.at[:, 1::2].set(jnp.cos(position * div_term))
    return (x + pe[None, :, :]).astype(x.dtype)


if __name__ == "__main__":
    key = jax.random.PRNGKey(0)
    B, S, D = 2, 8, 32
    x = jax.random.normal(key, (B, S, D), dtype=jnp.float32)

    ref = _reference(x)

    out = jax.block_until_ready(positional_encoding(x))

    assert out.shape == (B, S, D)
    assert out.dtype == x.dtype
    assert jnp.allclose(out, ref, atol=1e-5, rtol=1e-5), "mismatch vs reference"

    print("KERNEL_OK")
</pallas_src>

<mosaic_0001>
module attributes {stable_mosaic.version = 11 : i64} {
  func.func @_add_pe_kernel(%arg0: i32, %arg1: i32, %arg2: memref<1x8x32xf32, #tpu.memory_space<vmem>>, %arg3: memref<8x32xf32, #tpu.memory_space<vmem>>, %arg4: memref<1x8x32xf32, #tpu.memory_space<vmem>>) attributes {dimension_semantics = [#tpu.dimension_semantics<parallel>, #tpu.dimension_semantics<arbitrary>], iteration_bounds = array<i64: 1, 2>, scalar_prefetch = 0 : i64, scratch_operands = 0 : i64, tpu.core_type = #tpu.core_type<tc>, window_params = [{transform_indices = @transform_0, window_bounds = array<i64: 1, 8, 32>}, {transform_indices = @transform_1, window_bounds = array<i64: 8, 32>}, {transform_indices = @transform_2, window_bounds = array<i64: 1, 8, 32>}]} {
    %c0 = arith.constant 0 : index
    %c0_0 = arith.constant 0 : index
    %c0_1 = arith.constant 0 : index
    %0 = vector.load %arg2[%c0, %c0_0, %c0_1] : memref<1x8x32xf32, #tpu.memory_space<vmem>>, vector<1x8x32xf32>
    %1 = vector.shape_cast %0 : vector<1x8x32xf32> to vector<8x32xf32>
    %c0_2 = arith.constant 0 : index
    %c0_3 = arith.constant 0 : index
    %2 = vector.load %arg3[%c0_2, %c0_3] : memref<8x32xf32, #tpu.memory_space<vmem>>, vector<8x32xf32>
    %3 = arith.addf %1, %2 : vector<8x32xf32>
    %c0_4 = arith.constant 0 : index
    %c0_5 = arith.constant 0 : index
    %c0_6 = arith.constant 0 : index
    %4 = vector.load %arg4[%c0_4, %c0_5, %c0_6] : memref<1x8x32xf32, #tpu.memory_space<vmem>>, vector<1x8x32xf32>
    %5 = vector.shape_cast %4 : vector<1x8x32xf32> to vector<8x32xf32>
    %6 = vector.shape_cast %3 : vector<8x32xf32> to vector<1x8x32xf32>
    tpu.vector_store %arg4[%c0_4, %c0_5, %c0_6], %6 {strides = array<i32>} : memref<1x8x32xf32, #tpu.memory_space<vmem>>, vector<1x8x32xf32>,
    return
  }
  func.func @transform_0(%arg0: i32, %arg1: i32) -> (i32, i32, i32) {
    %c0_i32 = arith.constant 0 : i32
    %c0_i32_0 = arith.constant 0 : i32
    return %arg1, %arg0, %c0_i32 : i32, i32, i32
  }
  func.func @transform_1(%arg0: i32, %arg1: i32) -> (i32, i32) {
    %c0_i32 = arith.constant 0 : i32
    %c0_i32_0 = arith.constant 0 : i32
    return %arg0, %c0_i32 : i32, i32
  }
  func.func @transform_2(%arg0: i32, %arg1: i32) -> (i32, i32, i32) {
    %c0_i32 = arith.constant 0 : i32
    %c0_i32_0 = arith.constant 0 : i32
    return %arg1, %arg0, %c0_i32 : i32, i32, i32
  }
}

</mosaic_0001>

<bundles_post_ra>
// kernel: tpu_custom_call.1
= control target key start
LH: loop header
LB: loop body
LE: loop exit
PB: predicated region body
PF: predicated region fallthrough
CT: control target
= control target key end

     0   :  { %7 = vsyncpa [#allocation3], 0  ;;  %s776_s0 = inlined_call_operand.hbm [shape: f32[2,8,32], index: 0, kind: input, shape index: {}]   ;;  %s777_s1 = inlined_call_operand.hbm [shape: f32[8,32], index: 1, kind: input, shape index: {}]   ;;  %s778_s2 = inlined_call_operand.hbm [shape: f32[2,8,32], index: 2, kind: output, shape index: {}]  }
   0x1   :  { %9 = vsyncpa [#allocation3 + $0x1], 0 }
   0x2   :  { %10 = vsyncpa [#allocation6], 0 }
   0x3   :  { %11 = vsyncpa [#allocation4], 0 }
   0x4   :  { %13 = vsyncpa [#allocation4 + $0x1], 0  ;;  %s560_s9 = smov 0   ;;  %s562_s10 = smov 0  }
   0x5   :  { %s564_s11 = smov 0   ;;  %s566_s12 = smov 0  }
   0x6   :  { %s568_s13 = smov 0   ;;  %s570_s14 = smov 0  }
   0x7 LB: > { %s308_s15 = sadd.s32 4294967295, %s540_s14   ;;  %s309_s16 = sadd.s32 4294967294, %s540_s14   ;;  %s540_s14 = sphi %s570_s14, %s19_s14   ;;  %s536_s13 = sphi %s568_s13, %s803_s13   ;;  %s532_s12 = sphi %s566_s12, %s802_s12   ;;  %s528_s11 = sphi %s564_s11, %s801_s11   ;;  %s524_s10 = sphi %s562_s10, %s800_s10   ;;  %s520_s9 = sphi %s560_s9, %s799_s9  }
   0x8   : > { %p53_p0 = scmp.ne.s32.totalorder %s524_s10, %s520_s9  ;;  %p594_p1 = scmp.eq.s32.totalorder %s308_s15, 0 }
   0x9   : > { %p598_p2 = scmp.eq.s32.totalorder %s308_s15, 1  ;;  %p111_p3 = scmp.eq.s32.totalorder %s309_s16, 1 }
   0xa   : > { %s783_s17 = scalar_select %p594_p1, 1, 0 }
   0xb   : > { %s784_s18 = scalar_select %p598_p2, 1, 0 }
   0xc   : > { %p604_p4 = por %p594_p1, %p53_p0  ;;  %p310_p5 = scmp.ge.s32.totalorder %s540_s14, 1 }
   0xd   : > { %p609_p6 = por %p111_p3, %p53_p0  ;;  %p118_p7 = scmp.lt.s32.totalorder %s540_s14, 3 }
   0xe   : > { %s785_s19 = scalar_select %p604_p4, 1, 0 }
   0xf   : > { %s786_s20 = scalar_select %p609_p6, 1, 0 }
  0x10   : > { %p614_p8 = pnand %p310_p5, %p118_p7  ;;  %s542_s22 = smov [#allocation5]  }
  0x11   : > { %s133_s23 = sshll.u32 %s542_s22, 4  ;;  %s28_s25 = sadd.s32 1, %s536_s13  ;;  %s134_s23 = int_to_ptr.vmem [resolvable:$true] %s133_s23 }
  0x12   : > { %s787_s21 = scalar_select %p614_p8, 1, 0 }
  0x13   : > { %p331_p10 = pneg %p614_p8  ;;  %s40_s26 = sadd.s32 1, %s528_s11 }
  0x14   : > { %p629_p12 = scmp.ge.s32.totalorder %s28_s25, 2  ;;  %s396_s30 = scalar_lea.hbm %s777_s1, 128 }
  0x15   : > { %p623_p11 = pnand %p331_p10, %p594_p1  ;;  %p397_p13 = scmp.ne.s32.totalorder %s777_s1, %s396_s30 }
  0x16   : > { %s789_s27 = scalar_select %p629_p12, 1, 0 }
  0x17   : > { %p398_p0 = pneg %p623_p11  ;;  %p403_p7 = scmp.lt.u32.totalorder %s396_s30, %s777_s1 }
  0x19   : > { %p399_p3 = pnand %p398_p0, %p397_p13 }
  0x1b   : > { %p400_p5 = pneg %p399_p3 }
  0x1d   : > { %p405_p10 = pnand %p403_p7, %p400_p5 }
  0x1f   : > { %408 = shalt.err (!%p405_p10)
}
  0x20   : > { %s409_s7 = scalar_lea.vmem %s134_s23, 128  ;;  %p417_p4 = scmp.lt.s32.totalorder %s134_s23, %s134_s23 }
  0x21   : > { %p410_p9 = scmp.ne.s32.totalorder %s134_s23, %s409_s7  ;;  %p418_p8 = scmp.lt.s32.totalorder %s409_s7, %s409_s7 }
  0x23   : > { %p412_p6 = pnand %p410_p9, %p398_p0  ;;  %p419_p2 = por %p418_p8, %p417_p4 }
  0x25   : > { %p413_p1 = pneg %p412_p6 }
  0x27   : > { %p420_p12 = pnand %p419_p2, %p413_p1 }
  0x29   : > { %423 = shalt.err (!%p420_p12)
}
  0x2a   : > { %334 = dma.hbm_to_vmem [thread:$0]  (!%p623_p11), %s777_s1, 128, %s134_s23, [#allocation6]  }
  0x2b   : > { %p790_p4 = scmp.ne.s32.totalorder %s789_s27, 0  ;;  %p47_p1 = scmp.ne.s32.totalorder %s528_s11, %s524_s10 }
  0x2c   : > { %p48_p2 = scmp.eq.s32.totalorder %s540_s14, 0  ;;  %p344_p6 = scmp.lt.s32.totalorder %s540_s14, 2 }
  0x2d   : > { %s805_s25 = smov (%p790_p4, %s28_s25), 0  ;;  %p791_p12 = scmp.ne.s32.totalorder %s784_s18, 0 }
  0x2e   : > { %s35_s16 = ssub.s32 %s536_s13, %s805_s25  ;;  %p49_p9 = por %p48_p2, %p47_p1 }
  0x2f   : > { %p38_p8 = scmp.eq.s32.totalorder %s35_s16, 0  ;;  %p661_p13 = por %p791_p12, %p47_p1 }
  0x30   : > { %s144_s24 = sand.u32 1, %s528_s11   ;;  %s314_s27 = sshll.u32 %s536_s13, 7 }
  0x31   : > { %s669_s28 = scalar_select %p38_p8, %s528_s11, %s40_s26  }
  0x32   : > { %s313_s23 = sshll.u32 %s144_s24, 3  ;;  %s675_s3 = scalar_lea.hbm %s776_s0, %s314_s27 }
  0x33   : > { %s148_s18 = scalar_lea.vmem [#allocation2], %s313_s23  ;;  %p679_p11 = pnand %p344_p6, %p49_p9 }
  0x34   : > { %s156_s4 = sshll.u32 %s148_s18, 4  ;;  %s145_s26 = scalar_lea.sflag [#allocation3], %s144_s24  ;;  %s677_s4 = int_to_ptr.vmem [resolvable:$true] %s156_s4 }
  0x35   : > { %s424_s6 = scalar_lea.hbm %s675_s3, 128  ;;  %p426_p3 = pneg %p679_p11 }
  0x36   : > { %p425_p0 = scmp.ne.s32.totalorder %s675_s3, %s424_s6  ;;  %s429_s15 = scalar_lea.hbm %s776_s0, 256 }
  0x37   : > { %p430_p10 = scmp.lt.u32.totalorder %s675_s3, %s776_s0  ;;  %p431_p4 = scmp.lt.u32.totalorder %s429_s15, %s424_s6 }
  0x38   : > { %p427_p5 = pnand %p426_p3, %p425_p0  ;;  %p433_p2 = scmp.lt.u32.totalorder %s424_s6, %s675_s3 }
  0x39   : > { %p432_p1 = por %p431_p4, %p430_p10 }
  0x3a   : > { %p428_p7 = pneg %p427_p5 }
  0x3b   : > { %p434_p6 = por %p433_p2, %p432_p1 }
  0x3d   : > { %p435_p8 = pnand %p434_p6, %p428_p7 }
  0x3f   : > { %438 = shalt.err (!%p435_p8)
}
  0x40   : > { %s439_s24 = scalar_lea.vmem %s677_s4, 128  ;;  %s543_s27 = smov [#allocation2]  }
  0x41   : > { %p440_p9 = scmp.ne.s32.totalorder %s677_s4, %s439_s24  ;;  %s444_s29 = sshll.u32 %s543_s27, 4  ;;  %s445_s29 = int_to_ptr.vmem [resolvable:$false] %s444_s29 }
  0x42   : > { %s446_s30 = scalar_lea.vmem %s445_s29, 256  ;;  %p447_p5 = scmp.lt.s32.totalorder %s677_s4, %s445_s29 }
  0x43   : > { %p442_p12 = pnand %p440_p9, %p426_p3  ;;  %p448_p10 = scmp.lt.s32.totalorder %s446_s30, %s439_s24 }
  0x45   : > { %p443_p0 = pneg %p442_p12  ;;  %p449_p4 = por %p448_p10, %p447_p5 }
  0x47   : > { %p450_p1 = pnand %p449_p4, %p443_p0 }
  0x49   : > { %453 = shalt.err (!%p450_p1)
}
  0x4a   : > { %338 = dma.hbm_to_vmem [thread:$0]  (!%p679_p11), %s675_s3, 128, %s677_s4, %s145_s26  }
  0x4b   : > { %p794_p7 = scmp.ne.s32.totalorder %s787_s21, 0 }
  0x4c   : > { %s711_s18 = sand.u32 (!%p794_p7), 1, %s524_s10   ;;  %p795_p3 = scmp.ne.s32.totalorder (!%p794_p7), %s785_s19, 0 }
  0x4d   : > { %165 = sbr.rel (%p794_p7) target bundleno = 113 (0x71), region = 28  ;;  %s316_s6 = sshll.u32 (!%p794_p7), %s711_s18, 3 }
  0x4e   : > { %s168_s7 = scalar_lea.sflag (!%p794_p7), [#allocation3], %s711_s18  ;;  %s171_s8 = scalar_lea.vmem (!%p794_p7), [#allocation2], %s316_s6 }
  0x54   : > { %507 = dma.done.wait (%p795_p3), %s168_s7, 128  }
  0x55   : > { %509 = vsyncadd (%p795_p3), %s168_s7, 4294967168  ;;  %p796_p2 = scmp.ne.s32.totalorder %s783_s17, 0 }
  0x57   : > { %511 = dma.done.wait (%p796_p2), [#allocation6], 128  }
  0x58   : > { %513 = vsyncadd (%p796_p2), [#allocation6], 4294967168  ;;  %s195_s21 = scalar_lea.vmem [#allocation7], %s316_s6  ;;  %s320_s4 = sshll.u32 %s532_s12, 7  ;;  %v196_v0 = vld [vmem:[%s171_s8] sm:$0xff]  ;;  %v197_v1 = vld [vmem:[#allocation5] sm:$0xff] }
  0x59   : > { %s216_s3 = sshll.u32 %s195_s21, 4  ;;  %vm199_vm0 = vcmask 261120   ;;  %v198_v2 = vadd.f32 %v197_v1, %v196_v0  ;;  %s729_s17 = scalar_lea.hbm %s778_s2, %s320_s4  ;;  %s724_s3 = int_to_ptr.vmem [resolvable:$true] %s216_s3 }
  0x5a   : > { %s202_s26 = scalar_lea.sflag [#allocation4], %s711_s18  ;;  %s454_s15 = scalar_lea.vmem %s724_s3, 128 }
  0x5b   : > { %200 = vst.msk [vmem:[%s195_s21] sm:$0xff] %vm199_vm0, %v198_v2  ;;  %p455_p11 = scmp.ne.s32.totalorder %s724_s3, %s454_s15  ;;  %s544_s12 = smov [#allocation7]  }
  0x5c   : > { %s458_s16 = sshll.u32 %s544_s12, 4  ;;  %s459_s16 = int_to_ptr.vmem [resolvable:$false] %s458_s16 }
  0x5d   : > { %p456_p6 = pnand %p455_p11, %p661_p13  ;;  %s460_s23 = scalar_lea.vmem %s459_s16, 256 }
  0x5e   : > { %p461_p9 = scmp.lt.s32.totalorder %s724_s3, %s459_s16  ;;  %p462_p12 = scmp.lt.s32.totalorder %s460_s23, %s454_s15 }
  0x5f   : > { %p457_p8 = pneg %p456_p6 }
  0x60   : > { %p463_p0 = por %p462_p12, %p461_p9 }
  0x62   : > { %p464_p5 = pnand %p463_p0, %p457_p8 }
  0x64   : > { %467 = shalt.err (!%p464_p5)
}
  0x65   : > { %s468_s24 = scalar_lea.hbm %s729_s17, 128  ;;  %s472_s30 = scalar_lea.hbm %s778_s2, 256 }
  0x66   : > { %p469_p10 = scmp.ne.s32.totalorder %s729_s17, %s468_s24  ;;  %p473_p7 = scmp.lt.u32.totalorder %s729_s17, %s778_s2 }
  0x67   : > { %p474_p3 = scmp.lt.u32.totalorder %s472_s30, %s468_s24  ;;  %p476_p11 = scmp.lt.u32.totalorder %s468_s24, %s729_s17 }
  0x68   : > { %p470_p4 = pnand %p469_p10, %p661_p13 }
  0x69   : > { %p475_p2 = por %p474_p3, %p473_p7 }
  0x6a   : > { %p471_p1 = pneg %p470_p4 }
  0x6b   : > { %p477_p6 = por %p476_p11, %p475_p2 }
  0x6d   : > { %p478_p8 = pnand %p477_p6, %p471_p1 }
  0x6f   : > { %481 = shalt.err (!%p478_p8)
}
  0x70   : > { %329 = dma.vmem_to_hbm [thread:$0]  (%p661_p13), %s724_s3, 128, %s729_s17, %s202_s26  }
  0x71 PF: > { %s228_s7 = sand.u32 1, %s520_s9   ;;  %p797_p9 = scmp.ne.s32.totalorder %s786_s20, 0 }
  0x72   : > { %p798_p12 = scmp.ge.s32.totalorder %s540_s14, 2  ;;  %s229_s8 = scalar_lea.sflag [#allocation4], %s228_s7 }
  0x74   : > { %p340_p0 = pnand %p798_p12, %p797_p9 }
  0x76   : > { %515 = dma.done.wait (!%p340_p0), %s229_s8, 128  }
  0x77   : > { %517 = vsyncadd (!%p340_p0), %s229_s8, 4294967168  ;;  %s19_s14 = sadd.s32 1, %s540_s14   ;;  %s799_s9 = smov %s524_s10 }
  0x78   : > { %p16_p5 = scmp.ge.s32.totalorder %s19_s14, 4   ;;  %s800_s10 = smov %s528_s11 }
  0x79   : > { %s801_s11 = smov %s669_s28  ;;  %s802_s12 = smov %s536_s13 }
  0x7a   : > { %s803_s13 = smov %s805_s25  ;;  %18 = sbr.rel (!%p16_p5) target bundleno = 7 (0x7), region = 78 }
  0x81   :  { %234 = vsyncpa [#allocation3], 1 }
  0x82   :  { %236 = vsyncpa [#allocation3 + $0x1], 1 }
  0x83   :  { %237 = vsyncpa [#allocation6], 1 }
  0x84   :  { %238 = vsyncpa [#allocation4], 1 }
  0x85   :  { %240 = vsyncpa [#allocation4 + $0x1], 1 }

</bundles_post_ra>
